<compile_context>
chip_gen: v5e
topology: v5e:2x2
jax: 0.10.0
libtpu: 0.0.40
codegen_flags: <defaults>
</compile_context>

<pallas_src>
import jax
import jax.numpy as jnp
from jax.experimental import pallas as pl
from jax.experimental.pallas import tpu as pltpu


def _disc_kernel_2class(x_ref, w1_ref, b1_ref, wdiff_ref, bdiff_ref, o_ref):
    """Specialized path for disc_arch[-1] == 2 (softmax == sigmoid of logit diff)."""
    x = x_ref[...]                                                   # (B, D0)
    h = jax.nn.sigmoid(
        jnp.dot(x, w1_ref[...], preferred_element_type=jnp.float32) + b1_ref[...]
    )                                                                # (B, D1)
    # Logit difference (l1 - l0): VPU multiply + XLU lane-reduce, no second MXU pass.
    z = jnp.sum(h * wdiff_ref[...], axis=-1, keepdims=True) + bdiff_ref[...]   # (B, 1)
    p1 = jax.nn.sigmoid(z)                                           # (B, 1)
    col = jax.lax.broadcasted_iota(jnp.int32, o_ref.shape, dimension=1)
    o_ref[...] = jnp.where(col == 0, 1.0 - p1, p1).astype(o_ref.dtype)


def _disc_kernel_generic(x_ref, w1_ref, b1_ref, w2_ref, b2_ref, o_ref):
    """Fallback: full second matmul + numerically-stable softmax (any output width)."""
    x = x_ref[...]                                                   # (B, D0)
    h = jax.nn.sigmoid(
        jnp.dot(x, w1_ref[...], preferred_element_type=jnp.float32) + b1_ref[...]
    )                                                                # (B, D1)
    logits = jnp.dot(h, w2_ref[...], preferred_element_type=jnp.float32) + b2_ref[...]
    m = jnp.max(logits, axis=-1, keepdims=True)
    e = jnp.exp(logits - m)
    # approx=False keeps rows summing to 1 within 1e-5 (see review correctness note).
    denom_inv = pl.reciprocal(jnp.sum(e, axis=-1, keepdims=True), approx=False)
    o_ref[...] = (e * denom_inv).astype(o_ref.dtype)


def discriminator_forward(x, w1, b1, w2, b2):
    """x: (B, D0) f32; w1: (D0, D1); b1: (1, D1); w2: (D1, D2); b2: (1, D2)."""
    B, _ = x.shape
    D1 = w1.shape[1]
    D2 = w2.shape[1]
    vmem = pl.BlockSpec(memory_space=pltpu.MemorySpace.VMEM)

    if D2 == 2:
        # Fold the 2-class head into a single logit-difference vector (done once,
        # outside the kernel; weights are static per forward pass).
        wdiff = (w2[:, 1] - w2[:, 0]).reshape(1, D1)    # (1, D1)
        bdiff = (b2[:, 1:2] - b2[:, 0:1])               # (1, 1)
        return pl.pallas_call(
            _disc_kernel_2class,
            out_shape=jax.ShapeDtypeStruct((B, D2), jnp.float32),
            in_specs=[vmem, vmem, vmem, vmem, vmem],
            out_specs=vmem,
        )(x, w1, b1, wdiff, bdiff)

    return pl.pallas_call(
        _disc_kernel_generic,
        out_shape=jax.ShapeDtypeStruct((B, D2), jnp.float32),
        in_specs=[vmem, vmem, vmem, vmem, vmem],
        out_specs=vmem,
    )(x, w1, b1, w2, b2)


def reference_forward(x, w1, b1, w2, b2):
    h = jax.nn.sigmoid(x @ w1 + b1)
    logits = h @ w2 + b2
    return jax.nn.softmax(logits, axis=-1)


def _make_params(key, D_in, D_out):
    k_w, k_b = jax.random.split(key)
    bound = 1.0 / jnp.sqrt(D_in)
    w = jax.random.uniform(k_w, (D_in, D_out), jnp.float32, -bound, bound)
    b = jax.random.uniform(k_b, (1, D_out), jnp.float32, -bound, bound)
    return w, b


if __name__ == "__main__":
    # disc_arch = [32, 64, 2]  (input dim, hidden dim, 2-class output)
    B, D0, D1, D2 = 8, 32, 64, 2
    key = jax.random.PRNGKey(0)
    kx, kl1, kl2, kl3 = jax.random.split(key, 4)

    x = jax.random.normal(kx, (B, D0), dtype=jnp.float32)
    w1, b1 = _make_params(kl1, D0, D1)
    w2, b2 = _make_params(kl2, D1, D2)

    # Primary (2-class specialized) path.
    out = jax.block_until_ready(discriminator_forward(x, w1, b1, w2, b2))
    ref = reference_forward(x, w1, b1, w2, b2)
    assert out.shape == (B, D2)
    assert jnp.allclose(out, ref, atol=1e-5, rtol=1e-5), "2-class path mismatch vs JAX reference"
    assert jnp.allclose(jnp.sum(out, axis=-1), 1.0, atol=1e-5), "softmax rows must sum to 1"

    # Generic-softmax fallback path (arch with a non-2 output width).
    D2g = 4
    w2g, b2g = _make_params(kl3, D1, D2g)
    out_g = jax.block_until_ready(discriminator_forward(x, w1, b1, w2g, b2g))
    ref_g = reference_forward(x, w1, b1, w2g, b2g)
    assert out_g.shape == (B, D2g)
    assert jnp.allclose(out_g, ref_g, atol=1e-5, rtol=1e-5), "generic path mismatch vs JAX reference"
    assert jnp.allclose(jnp.sum(out_g, axis=-1), 1.0, atol=1e-5), "softmax rows must sum to 1"

    print("KERNEL_OK")
</pallas_src>

<mosaic_0001>
module attributes {stable_mosaic.version = 11 : i64} {
  func.func @_disc_kernel_2class(%arg0: memref<8x32xf32, #tpu.memory_space<vmem>>, %arg1: memref<32x64xf32, #tpu.memory_space<vmem>>, %arg2: memref<1x64xf32, #tpu.memory_space<vmem>>, %arg3: memref<1x64xf32, #tpu.memory_space<vmem>>, %arg4: memref<1x1xf32, #tpu.memory_space<vmem>>, %arg5: memref<8x2xf32, #tpu.memory_space<vmem>>) attributes {dimension_semantics = [], scalar_prefetch = 0 : i64, scratch_operands = 0 : i64, tpu.core_type = #tpu.core_type<tc>} {
    %c0 = arith.constant 0 : index
    %c0_0 = arith.constant 0 : index
    %0 = vector.load %arg0[%c0, %c0_0] : memref<8x32xf32, #tpu.memory_space<vmem>>, vector<8x32xf32>
    %c0_1 = arith.constant 0 : index
    %c0_2 = arith.constant 0 : index
    %1 = vector.load %arg1[%c0_1, %c0_2] : memref<32x64xf32, #tpu.memory_space<vmem>>, vector<32x64xf32>
    %cst = arith.constant dense<0.000000e+00> : vector<8x64xf32>
    %2 = tpu.matmul %0, %1, %cst {dimension_numbers = #tpu.dot_dimension_numbers<[1], [0], [0], [1], [0, 0, 1, 1], [], []>} : vector<8x32xf32>, vector<32x64xf32>, vector<8x64xf32> -> vector<8x64xf32>
    %c0_3 = arith.constant 0 : index
    %c0_4 = arith.constant 0 : index
    %3 = vector.load %arg2[%c0_3, %c0_4] : memref<1x64xf32, #tpu.memory_space<vmem>>, vector<1x64xf32>
    %4 = vector.broadcast %3 : vector<1x64xf32> to vector<8x64xf32>
    %5 = arith.addf %2, %4 : vector<8x64xf32>
    %6 = arith.negf %5 : vector<8x64xf32>
    %7 = math.exp %6 : vector<8x64xf32>
    %cst_5 = arith.constant 1.000000e+00 : f32
    %8 = vector.broadcast %cst_5 : f32 to vector<8x64xf32>
    %9 = arith.addf %8, %7 : vector<8x64xf32>
    %10 = arith.divf %8, %9 : vector<8x64xf32>
    %c0_6 = arith.constant 0 : index
    %c0_7 = arith.constant 0 : index
    %11 = vector.load %arg3[%c0_6, %c0_7] : memref<1x64xf32, #tpu.memory_space<vmem>>, vector<1x64xf32>
    %12 = vector.broadcast %11 : vector<1x64xf32> to vector<8x64xf32>
    %13 = arith.mulf %10, %12 : vector<8x64xf32>
    %cst_8 = arith.constant dense<0.000000e+00> : vector<8xf32>
    %14 = vector.multi_reduction <add>, %13, %cst_8 [1] : vector<8x64xf32> to vector<8xf32>
    %15 = vector.shape_cast %14 : vector<8xf32> to vector<8x1xf32>
    %c0_9 = arith.constant 0 : index
    %c0_10 = arith.constant 0 : index
    %16 = vector.load %arg4[%c0_9, %c0_10] : memref<1x1xf32, #tpu.memory_space<vmem>>, vector<1x1xf32>
    %17 = vector.broadcast %16 : vector<1x1xf32> to vector<8x1xf32>
    %18 = arith.addf %15, %17 : vector<8x1xf32>
    %19 = arith.negf %18 : vector<8x1xf32>
    %20 = math.exp %19 : vector<8x1xf32>
    %cst_11 = arith.constant 1.000000e+00 : f32
    %21 = vector.broadcast %cst_11 : f32 to vector<8x1xf32>
    %22 = arith.addf %21, %20 : vector<8x1xf32>
    %23 = arith.divf %21, %22 : vector<8x1xf32>
    %24 = tpu.iota {dimensions = array<i32: 1>} : vector<8x2xi32>
    %c0_i32 = arith.constant 0 : i32
    %25 = vector.broadcast %c0_i32 : i32 to vector<8x2xi32>
    %26 = arith.cmpi eq, %24, %25 : vector<8x2xi32>
    %cst_12 = arith.constant 1.000000e+00 : f32
    %27 = vector.broadcast %cst_12 : f32 to vector<8x1xf32>
    %28 = arith.subf %27, %23 : vector<8x1xf32>
    %29 = vector.shape_cast %28 : vector<8x1xf32> to vector<8x1xf32>
    %30 = vector.broadcast %29 : vector<8x1xf32> to vector<8x2xf32>
    %31 = vector.shape_cast %23 : vector<8x1xf32> to vector<8x1xf32>
    %32 = vector.broadcast %31 : vector<8x1xf32> to vector<8x2xf32>
    %33 = arith.select %26, %30, %32 : vector<8x2xi1>, vector<8x2xf32>
    %c0_13 = arith.constant 0 : index
    %c0_14 = arith.constant 0 : index
    %34 = vector.load %arg5[%c0_13, %c0_14] : memref<8x2xf32, #tpu.memory_space<vmem>>, vector<8x2xf32>
    tpu.vector_store %arg5[%c0_13, %c0_14], %33 {strides = array<i32>} : memref<8x2xf32, #tpu.memory_space<vmem>>, vector<8x2xf32>,
    return
  }
}

</mosaic_0001>

<bundles_post_ra>
// kernel: tpu_custom_call.1
= control target key start
LH: loop header
LB: loop body
LE: loop exit
PB: predicated region body
PF: predicated region fallthrough
CT: control target
= control target key end

     0   :  { %s286_s0 = inlined_call_operand.hbm [shape: f32[8,32], index: 0, kind: input, shape index: {}]   ;;  %s287_s1 = inlined_call_operand.hbm [shape: f32[32,64], index: 1, kind: input, shape index: {}]   ;;  %s288_s2 = inlined_call_operand.vmem [shape: f32[1,64], index: 2, kind: input, shape index: {}]   ;;  %s289_s3 = inlined_call_operand.vmem [shape: f32[1,64], index: 3, kind: input, shape index: {}]   ;;  %s290_s4 = inlined_call_operand.<no memory space> [shape: f32[1,1], index: 4, kind: input, shape index: {}]   ;;  %s291_s5 = inlined_call_operand.vmem [shape: f32[8,2], index: 5, kind: output, shape index: {}]  }
   0x1   :  { %v10_v0 = vstv %s290_s4 }
   0x2   :  { %11 = vst [vmem:[#allocation2] sm:$0x1] %v10_v0 }
   0x3   :  { %12 = vsyncpa [#allocation4], 0  ;;  %s19_s22 = sshll.u32 %s286_s0, 4  ;;  %s20_s22 = int_to_ptr.hbm [resolvable:$true] %s19_s22 }
   0x4   :  { %13 = vsyncpa [#allocation6], 0  ;;  %s233_s23 = smov [#allocation3]   ;;  %s29_s27 = sshll.u32 %s287_s1, 4  ;;  %s30_s27 = int_to_ptr.hbm [resolvable:$true] %s29_s27 }
   0x5   :  { %s21_s24 = sshll.u32 %s233_s23, 4  ;;  %s234_s28 = smov [#allocation5]   ;;  %s22_s24 = int_to_ptr.vmem [resolvable:$true] %s21_s24 }
   0x6   :  { %24 = dma.hbm_to_vmem [thread:$0]  %s20_s22, 128, %s22_s24, [#allocation4]  }
   0x7   :  { %s31_s29 = sshll.u32 %s234_s28, 4  ;;  %s235_s4 = smov 128   ;;  %s32_s29 = int_to_ptr.vmem [resolvable:$true] %s31_s29 }
   0x8   :  { %s236_s30 = smov 8  }
   0x9   :  { %37 = dma.hbm_to_vmem [thread:$0]  %s30_s27, 512, %s32_s29, [#allocation6], %s235_s4, %s235_s4, %s236_s30  }
   0xa   :  { %229 = dma.done.wait [#allocation4], 128  }
   0xb   :  { %230 = vsyncadd [#allocation4], 4294967168 }
   0xc   :  { %231 = dma.done.wait [#allocation6], 512  }
   0xd   :  { %232 = vsyncadd [#allocation6], 4294966784  ;;  %v56_v1 = vld [vmem:[#allocation5 + $0x18] sm:$0xff]  ;;  %v55_v2 = vld [vmem:[#allocation5 + $0x10] sm:$0xff]  ;;  %vm61_vm0 = vcmask 261120   ;;  %vm109_vm5 = vcmask 523264   ;;  %v137_v43 = vlaneseq }
   0xe   :  { %77 = vmatpush.msra.mxu0 %v56_v1  ;;  %v54_v3 = vld [vmem:[#allocation5 + $0x8] sm:$0xff]  ;;  %v53_v4 = vld [vmem:[#allocation5] sm:$0xff]  ;;  %v52_v5 = vld [vmem:[#allocation3] sm:$0xff]  ;;  %v237_v25 = vmov 0   ;;  %vm152_vm11 = vcmask 15360  }
   0xf   :  { %v170_v6 = vld [vmem:[%s288_s2] ss:$0 sm:$0xff]  ;;  %169 = vset.pattern.permute.xlu1 %v237_v25  ;;  %168 = vset.pattern.permute.xlu0 %v237_v25  ;;  %v138_v44 = vand.u32 127, %v137_v43 }
  0x10   :  { %78 = vmatpush.msra.mxu0 %v55_v2  ;;  %v171_v19 = vld [vmem:[%s289_s3] ss:$0 sm:$0xff] }
  0x11   :  { %v172_v26 = vld [vmem:[#allocation2] ss:$0 sm:$0xff]  ;;  %vm139_vm10 = vcmp.eq.s32.totalorder %v138_v44, 0 }
  0x12   :  { %79 = vmatpush.msra.mxu0 %v54_v3 }
  0x14   :  { %80 = vmatpush.msra.mxu0 %v53_v4 }
  0x15   :  { %160 = vmatmul.msk.f32.vlgmr.msra.gmra.mxu0 %vm61_vm0, %v52_v5 }
  0x92   :  { %v82_v7 = vpop.f32.mrf.mxu0 }
  0x93   :  { %v83_v8 = vadd.f32 %v170_v6, %v82_v7 }
  0x95   :  { %v161_v9 = vmul.f32 -1.442695, %v83_v8 }
  0x97   :  { %173 = vpow2.f32 %v161_v9 }
  0x9d   :  { %v174_v10 = vpop.eup %173 }
  0x9e   :  { %v88_v11 = vadd.f32 1.0, %v174_v10 }
  0xa0   :  { %175 = vrcp.f32 %v88_v11  ;;  %v100_v15 = vand.u32 2147483648, %v88_v11  ;;  %v98_v17 = vand.u32 2147483647, %v88_v11  ;;  %vm94_vm2 = vweird.f32 %v88_v11 }
  0xa2   :  { %v101_v20 = vor.u32 1.1754944e-38, %v100_v15  ;;  %vm99_vm4 = vcmp.eq.f32.partialorder %v98_v17, 8.507059e+37 }
  0xa6   :  { %v176_v12 = vpop.eup %175 }
  0xa7   :  { %v90_v13 = vmul.f32 %v176_v12, %v88_v11  ;;  %vm95_vm1 = vweird.f32 %v176_v12 }
  0xa8   :  { %vm96_vm3 = vmor %vm94_vm2, %vm95_vm1 }
  0xa9   :  { %v91_v14 = vsub.f32 1.0, %v90_v13 }
  0xab   :  { %v92_v16 = vmul.f32 %v176_v12, %v91_v14 }
  0xad   :  { %v93_v18 = vadd.f32 %v176_v12, %v92_v16 }
  0xaf   :  { %v97_v21 = vsel %vm96_vm3, %v176_v12, %v93_v18 }
  0xb0   :  { %v102_v22 = vsel %vm99_vm4, %v101_v20, %v97_v21 }
  0xb1   :  { %v108_v23 = vmul.f32 %v171_v19, %v102_v22 }
  0xb3   :  { %v110_v24 = vsel %vm109_vm5, %v108_v23, 0.0 }
  0xb4   :  { %111 = vadd.xlane.f32.xlu0 %v110_v24 }
 0x127   :  { %v112_v27 = vpop.xlane.xlu0 %111 }
 0x128   :  { %v117_v28 = vadd.f32 %v172_v26, %v112_v27 }
 0x12a   :  { %v162_v29 = vmul.f32 -1.442695, %v117_v28 }
 0x12c   :  { %177 = vpow2.f32 %v162_v29 }
 0x132   :  { %v178_v30 = vpop.eup %177 }
 0x133   :  { %v121_v31 = vadd.f32 1.0, %v178_v30 }
 0x135   :  { %179 = vrcp.f32 %v121_v31  ;;  %v133_v35 = vand.u32 2147483648, %v121_v31  ;;  %v131_v37 = vand.u32 2147483647, %v121_v31  ;;  %vm127_vm7 = vweird.f32 %v121_v31 }
 0x137   :  { %v134_v39 = vor.u32 1.1754944e-38, %v133_v35  ;;  %vm132_vm9 = vcmp.eq.f32.partialorder %v131_v37, 8.507059e+37 }
 0x13b   :  { %v180_v32 = vpop.eup %179 }
 0x13c   :  { %v123_v33 = vmul.f32 %v180_v32, %v121_v31  ;;  %vm128_vm6 = vweird.f32 %v180_v32 }
 0x13d   :  { %vm129_vm8 = vmor %vm127_vm7, %vm128_vm6 }
 0x13e   :  { %v124_v34 = vsub.f32 1.0, %v123_v33 }
 0x140   :  { %v125_v36 = vmul.f32 %v180_v32, %v124_v34 }
 0x142   :  { %v126_v38 = vadd.f32 %v180_v32, %v125_v36 }
 0x144   :  { %v130_v40 = vsel %vm129_vm8, %v180_v32, %v126_v38 }
 0x145   :  { %v135_v41 = vsel %vm132_vm9, %v134_v39, %v130_v40 }
 0x146   :  { %148 = vperm.xlu1 %169, %v135_v41   ;;  %v140_v42 = vsub.f32 1.0, %v135_v41 }
 0x148   :  { %143 = vperm.xlu0 %168, %v140_v42  }
 0x1b8   :  { %v149_v45 = vpop.permute.xlu1 %148 }
 0x1ba   :  { %v144_v46 = vpop.permute.xlu0 %143 }
 0x1bb   :  { %v151_v47 = vsel %vm139_vm10, %v144_v46, %v149_v45 }
 0x1bc   :  { %153 = vst.msk [vmem:[%s291_s5] sm:$0xff] %vm152_vm11, %v151_v47 }
 0x1bd   :  { %158 = vsyncpa [#allocation4], 1 }
 0x1be   :  { %159 = vsyncpa [#allocation6], 1 }

</bundles_post_ra>
